<compile_context>
chip_gen: v7x
topology: tpu7x:2x2x1
jax: 0.10.0
libtpu: 0.0.40
codegen_flags: <defaults>
</compile_context>

<pallas_src>
import functools

import numpy as np
import jax
import jax.numpy as jnp
from jax.experimental import pallas as pl
from jax.experimental.pallas import tpu as pltpu


def _round_up(x, m):
    return ((x + m - 1) // m) * m


# ---------------------------------------------------------------------------
# Pallas kernel: fused (floor/clip -> gather of (PE@W1+b1) -> SiLU -> Linear)
# ---------------------------------------------------------------------------
def _box_embed_kernel(boxes_ref, t1_ref, w2_ref, b2_ref, o_ref, *, num_steps):
    tile_n = boxes_ref.shape[0]
    S = t1_ref.shape[0]                                    # padded table rows

    # ---- index math + gather, fused in-kernel -----------------------------
    b = boxes_ref[...]                                     # [tile_n, 1] f32
    idx = jnp.clip(jnp.floor(b * num_steps),
                   0.0, float(num_steps - 1)).astype(jnp.int32)
    steps = jax.lax.broadcasted_iota(jnp.int32, (tile_n, S), 1)  # [tile_n, S]
    onehot = (steps == idx).astype(t1_ref.dtype)           # bf16 one-hot directly
    # One-hot matmul == row gather of the VMEM-resident folded table
    # T1 = PE@W1 + b1 (exact: one nonzero bf16 product per output, f32 acc).
    h = jnp.dot(onehot, t1_ref[...], preferred_element_type=jnp.float32)

    # ---- SiLU -> second Linear (bf16 MXU operands, f32 accumulate; all
    #      elementwise math stays f32 so v5e's VPU/EUP stay on the f32 path) --
    h = h * jax.nn.sigmoid(h)                              # SiLU (f32)
    o = jnp.dot(h.astype(w2_ref.dtype), w2_ref[...],
                preferred_element_type=jnp.float32)
    o = o + b2_ref[...]
    o_ref[...] = o.astype(o_ref.dtype)                     # full-lane store


def box_embed_pallas(boxes_col, t1_p, w2_p, b2_p, *, num_steps, tile_n,
                     out_dtype=jnp.float32):
    """boxes_col: [N_pad, 1] f32 -> [N_pad, Dp] out_dtype (lane-dense, Dp%128==0)."""
    N_pad = boxes_col.shape[0]
    S_pad, Dp = t1_p.shape
    assert N_pad % tile_n == 0 and Dp % 128 == 0

    kernel = functools.partial(_box_embed_kernel, num_steps=num_steps)
    resident = lambda shape: pl.BlockSpec(shape, lambda i: (0, 0))  # VMEM-resident

    return pl.pallas_call(
        kernel,
        out_shape=jax.ShapeDtypeStruct((N_pad, Dp), out_dtype),
        grid_spec=pltpu.PrefetchScalarGridSpec(
            num_scalar_prefetch=0,
            grid=(N_pad // tile_n,),
            in_specs=[
                pl.BlockSpec((tile_n, 1), lambda i: (i, 0)),   # boxes (row-tiled)
                resident((S_pad, Dp)),                         # T1 = PE@W1+b1 (bf16)
                resident((Dp, Dp)),                            # W2 (bf16)
                resident((1, Dp)),                             # b2 (f32)
            ],
            out_specs=pl.BlockSpec((tile_n, Dp), lambda i: (i, 0)),
        ),
        compiler_params=pltpu.CompilerParams(
            dimension_semantics=("parallel",)),                # v7x: 2 TCs split rows
    )(boxes_col, t1_p, w2_p, b2_p)


# ---------------------------------------------------------------------------
# BoxEmbedder (thin JAX glue around the fused Pallas kernel)
# ---------------------------------------------------------------------------
class BoxEmbedderPallas:
    def __init__(self, feat_dim, num_steps, key, tile_n=None,
                 out_dtype=jnp.float32):
        self.feat_dim = feat_dim
        self.num_steps = num_steps
        self.tile_n = tile_n
        self.out_dtype = out_dtype

        D = feat_dim
        Dp = max(128, _round_up(D, 128))   # lane-dense padding target
        self.Dp = Dp

        # Deterministic sinusoidal positional-encoding table (pos_encoder.pe).
        pos = np.arange(num_steps, dtype=np.float32)[:, None]        # [S, 1]
        i = np.arange(D, dtype=np.float32)[None, :]                  # [1, D]
        div = np.power(10000.0, (2.0 * np.floor(i / 2.0)) / D)
        angles = pos / div
        pe = np.where((np.arange(D) % 2) == 0,
                      np.sin(angles), np.cos(angles)).astype(np.float32)

        # coord_embed = Linear(D,D) -> SiLU -> Linear(D,D); weights stored as
        # [D_in, D_out] so the kernel computes x @ W.
        k1, k2, k3, k4 = jax.random.split(key, 4)
        bound = 1.0 / np.sqrt(D)
        w1 = jax.random.uniform(k1, (D, D), jnp.float32, -bound, bound)
        b1 = jax.random.uniform(k2, (D,), jnp.float32, -bound, bound)
        w2 = jax.random.uniform(k3, (D, D), jnp.float32, -bound, bound)
        b2 = jax.random.uniform(k4, (D,), jnp.float32, -bound, bound)

        # Unpadded f32 copies (numerics source of truth / reference).
        self.pe, self.w1, self.b1, self.w2, self.b2 = jnp.asarray(pe), w1, b1, w2, b2

        # --- Exact fold of the first Linear into the gather table (f32, once).
        t1 = self.pe @ w1 + b1                               # [num_steps, D] f32

        # Padded kernel-side copies (built once, not per call).
        def pad2d(a, rows, cols, dtype):
            out = jnp.zeros((rows, cols), dtype)
            return out.at[:a.shape[0], :a.shape[1]].set(a.astype(dtype))

        S_pad = _round_up(num_steps, 16)                     # bf16 sublane tile
        self.t1_p = pad2d(t1, S_pad, Dp, jnp.bfloat16)       # folded table (bf16)
        self.w2_p = pad2d(w2, Dp, Dp, jnp.bfloat16)
        self.b2_p = pad2d(b2[None, :], 1, Dp, jnp.float32)   # bias stays f32

    def _pick_tile_n(self, N):
        if self.tile_n is not None:
            return self.tile_n
        if N <= 128:
            # Tiny N (deployed B*4 boxes): pure launch-latency regime ->
            # single grid step, no pipeline prologue/epilogue.
            return _round_up(N, 8)
        # Large row tiles (fewer ~0.35us grid steps), but always >= 2 steps so
        # both v7x TensorCores get rows; split N evenly to minimize padding.
        g = max(2, pl.cdiv(N, 1024))
        return _round_up(pl.cdiv(N, g), 8)

    def __call__(self, boxes):
        # boxes: [B, C] float32 in [0, 1)
        B, C = boxes.shape
        N = B * C

        tile_n = self._pick_tile_n(N)
        N_pad = _round_up(N, tile_n)

        boxes_col = boxes.reshape(N, 1).astype(jnp.float32)
        if N_pad != N:
            boxes_col = jnp.pad(boxes_col, ((0, N_pad - N), (0, 0)))

        out_p = box_embed_pallas(boxes_col, self.t1_p, self.w2_p, self.b2_p,
                                 num_steps=self.num_steps, tile_n=tile_n,
                                 out_dtype=self.out_dtype)
        # Drop row/lane padding and restore [B, C, D].
        return out_p[:N, :self.feat_dim].reshape(B, C, self.feat_dim)


# ---------------------------------------------------------------------------
# References for correctness checking.
# ---------------------------------------------------------------------------
def _reference_f32(model, boxes):
    """Pure-f32 reference == PyTorch module semantics."""
    B, C = boxes.shape
    idxs = jnp.clip(jnp.floor(boxes.reshape(-1) * model.num_steps),
                    0, model.num_steps - 1).astype(jnp.int32)
    pes = model.pe[idxs]
    h = pes @ model.w1 + model.b1
    h = h * jax.nn.sigmoid(h)
    o = h @ model.w2 + model.b2
    return o.reshape(B, C, model.feat_dim)


def _reference_matched(model, boxes):
    """Reference with the same fold/bf16-operand/f32-accumulate precision."""
    B, C = boxes.shape
    idxs = jnp.clip(jnp.floor(boxes.reshape(-1) * model.num_steps),
                    0, model.num_steps - 1).astype(jnp.int32)
    bf = jnp.bfloat16
    t1 = model.pe @ model.w1 + model.b1                       # exact f32 fold
    h = t1[idxs].astype(bf).astype(jnp.float32)               # bf16-rounded gather
    h = h * jax.nn.sigmoid(h)
    o = jnp.dot(h.astype(bf), model.w2.astype(bf),
                preferred_element_type=jnp.float32) + model.b2
    return o.reshape(B, C, model.feat_dim)


if __name__ == "__main__":
    key = jax.random.PRNGKey(0)
    k_param, k_box = jax.random.split(key)

    feat_dim = 32      # hidden dim of the coord-embed MLP
    num_steps = 64     # size of the positional-encoding table
    B, num_coords = 16, 4    # N = 64 rows

    boxes = jax.random.uniform(k_box, (B, num_coords), jnp.float32,
                               minval=0.0, maxval=0.999)

    # Default heuristic: tiny N -> single grid step (grid=(1,)).
    model = BoxEmbedderPallas(feat_dim, num_steps, k_param)
    out = jax.block_until_ready(model(boxes))
    assert out.shape == (B, num_coords, feat_dim), out.shape

    # Also exercise the multi-step grid path (tile_n=32 -> grid=(2,)).
    model_g2 = BoxEmbedderPallas(feat_dim, num_steps, k_param, tile_n=32)
    out_g2 = jax.block_until_ready(model_g2(boxes))

    # Tight check against a reference using identical fold/MXU precision.
    ref_m = _reference_matched(model, boxes)
    np.testing.assert_allclose(np.asarray(out), np.asarray(ref_m),
                               rtol=1e-4, atol=1e-4)
    np.testing.assert_allclose(np.asarray(out_g2), np.asarray(ref_m),
                               rtol=1e-4, atol=1e-4)

    # Loose check against the pure-f32 PyTorch-equivalent semantics
    # (bf16 MXU operands => ~1e-2 level deviation expected).
    ref_f = _reference_f32(model, boxes)
    np.testing.assert_allclose(np.asarray(out), np.asarray(ref_f),
                               rtol=5e-2, atol=5e-2)

    print("KERNEL_OK")
</pallas_src>

<mosaic_0001>
module attributes {stable_mosaic.version = 11 : i64} {
  func.func @_box_embed_kernel(%arg0: i32, %arg1: memref<64x1xf32, #tpu.memory_space<vmem>>, %arg2: memref<64x128xbf16, #tpu.memory_space<vmem>>, %arg3: memref<128x128xbf16, #tpu.memory_space<vmem>>, %arg4: memref<1x128xf32, #tpu.memory_space<vmem>>, %arg5: memref<64x128xf32, #tpu.memory_space<vmem>>) attributes {dimension_semantics = [#tpu.dimension_semantics<parallel>], iteration_bounds = array<i64: 1>, scalar_prefetch = 0 : i64, scratch_operands = 0 : i64, tpu.core_type = #tpu.core_type<tc>, window_params = [{transform_indices = @transform_0, window_bounds = array<i64: 64, 1>}, {pipeline_mode = #tpu.pipeline_mode<synchronous>, transform_indices = @transform_1, window_bounds = array<i64: 64, 128>}, {pipeline_mode = #tpu.pipeline_mode<synchronous>, transform_indices = @transform_2, window_bounds = array<i64: 128, 128>}, {pipeline_mode = #tpu.pipeline_mode<synchronous>, transform_indices = @transform_3, window_bounds = array<i64: 1, 128>}, {transform_indices = @transform_4, window_bounds = array<i64: 64, 128>}]} {
    %c0 = arith.constant 0 : index
    %c0_0 = arith.constant 0 : index
    %0 = vector.load %arg1[%c0, %c0_0] : memref<64x1xf32, #tpu.memory_space<vmem>>, vector<64x1xf32>
    %cst = arith.constant 6.400000e+01 : f32
    %1 = vector.broadcast %cst : f32 to vector<64x1xf32>
    %2 = arith.mulf %0, %1 : vector<64x1xf32>
    %3 = math.floor %2 : vector<64x1xf32>
    %cst_1 = arith.constant 0.000000e+00 : f32
    %cst_2 = arith.constant 6.300000e+01 : f32
    %4 = vector.broadcast %cst_1 : f32 to vector<64x1xf32>
    %5 = arith.maximumf %4, %3 : vector<64x1xf32>
    %6 = vector.broadcast %cst_2 : f32 to vector<64x1xf32>
    %7 = arith.minimumf %6, %5 : vector<64x1xf32>
    %8 = arith.fptosi %7 : vector<64x1xf32> to vector<64x1xi32>
    %9 = tpu.iota {dimensions = array<i32: 1>} : vector<64x64xi32>
    %10 = vector.broadcast %8 : vector<64x1xi32> to vector<64x64xi32>
    %11 = arith.cmpi eq, %9, %10 : vector<64x64xi32>
    %12 = arith.extui %11 : vector<64x64xi1> to vector<64x64xi32>
    %13 = arith.sitofp %12 : vector<64x64xi32> to vector<64x64xf32>
    %14 = arith.truncf %13 : vector<64x64xf32> to vector<64x64xbf16>
    %c0_3 = arith.constant 0 : index
    %c0_4 = arith.constant 0 : index
    %15 = vector.load %arg2[%c0_3, %c0_4] : memref<64x128xbf16, #tpu.memory_space<vmem>>, vector<64x128xbf16>
    %cst_5 = arith.constant dense<0.000000e+00> : vector<64x128xf32>
    %16 = tpu.matmul %14, %15, %cst_5 {dimension_numbers = #tpu.dot_dimension_numbers<[1], [0], [0], [1], [0, 0, 1, 1], [], []>} : vector<64x64xbf16>, vector<64x128xbf16>, vector<64x128xf32> -> vector<64x128xf32>
    %17 = arith.negf %16 : vector<64x128xf32>
    %18 = math.exp %17 : vector<64x128xf32>
    %cst_6 = arith.constant 1.000000e+00 : f32
    %19 = vector.broadcast %cst_6 : f32 to vector<64x128xf32>
    %20 = arith.addf %19, %18 : vector<64x128xf32>
    %21 = arith.divf %19, %20 : vector<64x128xf32>
    %22 = arith.mulf %16, %21 : vector<64x128xf32>
    %23 = arith.truncf %22 : vector<64x128xf32> to vector<64x128xbf16>
    %c0_7 = arith.constant 0 : index
    %c0_8 = arith.constant 0 : index
    %24 = vector.load %arg3[%c0_7, %c0_8] : memref<128x128xbf16, #tpu.memory_space<vmem>>, vector<128x128xbf16>
    %cst_9 = arith.constant dense<0.000000e+00> : vector<64x128xf32>
    %25 = tpu.matmul %23, %24, %cst_9 {dimension_numbers = #tpu.dot_dimension_numbers<[1], [0], [0], [1], [0, 0, 1, 1], [], []>} : vector<64x128xbf16>, vector<128x128xbf16>, vector<64x128xf32> -> vector<64x128xf32>
    %c0_10 = arith.constant 0 : index
    %c0_11 = arith.constant 0 : index
    %26 = vector.load %arg4[%c0_10, %c0_11] : memref<1x128xf32, #tpu.memory_space<vmem>>, vector<1x128xf32>
    %27 = vector.broadcast %26 : vector<1x128xf32> to vector<64x128xf32>
    %28 = arith.addf %25, %27 : vector<64x128xf32>
    %c0_12 = arith.constant 0 : index
    %c0_13 = arith.constant 0 : index
    %29 = vector.load %arg5[%c0_12, %c0_13] : memref<64x128xf32, #tpu.memory_space<vmem>>, vector<64x128xf32>
    tpu.vector_store %arg5[%c0_12, %c0_13], %28 {strides = array<i32>} : memref<64x128xf32, #tpu.memory_space<vmem>>, vector<64x128xf32>,
    return
  }
  func.func @transform_0(%arg0: i32) -> (i32, i32) {
    %c0_i32 = arith.constant 0 : i32
    %c0_i32_0 = arith.constant 0 : i32
    return %arg0, %c0_i32 : i32, i32
  }
  func.func @transform_1(%arg0: i32) -> (i32, i32) {
    %c0_i32 = arith.constant 0 : i32
    %c0_i32_0 = arith.constant 0 : i32
    %c0_i32_1 = arith.constant 0 : i32
    return %c0_i32, %c0_i32_0 : i32, i32
  }
  func.func @transform_2(%arg0: i32) -> (i32, i32) {
    %c0_i32 = arith.constant 0 : i32
    %c0_i32_0 = arith.constant 0 : i32
    %c0_i32_1 = arith.constant 0 : i32
    return %c0_i32, %c0_i32_0 : i32, i32
  }
  func.func @transform_3(%arg0: i32) -> (i32, i32) {
    %c0_i32 = arith.constant 0 : i32
    %c0_i32_0 = arith.constant 0 : i32
    %c0_i32_1 = arith.constant 0 : i32
    return %c0_i32, %c0_i32_0 : i32, i32
  }
  func.func @transform_4(%arg0: i32) -> (i32, i32) {
    %c0_i32 = arith.constant 0 : i32
    %c0_i32_0 = arith.constant 0 : i32
    return %arg0, %c0_i32 : i32, i32
  }
}

</mosaic_0001>

<bundles_post_ra>
// kernel: tpu_custom_call.1
= control target key start
LH: loop header
LB: loop body
LE: loop exit
PB: predicated region body
PF: predicated region fallthrough
CT: control target
= control target key end

     0   :  { %9 = vsyncpa [#allocation3], 0  ;;  %s789_s0 = inlined_call_operand.vmem [shape: f32[64,1], index: 0, kind: input, shape index: {}]   ;;  %s790_s1 = inlined_call_operand.hbm [shape: bf16[64,128], index: 1, kind: input, shape index: {}]   ;;  %s791_s2 = inlined_call_operand.vmem [shape: bf16[128,128], index: 2, kind: input, shape index: {}]   ;;  %s792_s3 = inlined_call_operand.vmem [shape: f32[1,128], index: 3, kind: input, shape index: {}]   ;;  %s793_s4 = inlined_call_operand.hbm [shape: f32[64,128], index: 4, kind: output, shape index: {}]  }
   0x1   :  { %10 = vsyncpa [#allocation4], 0  ;;  %s677_s15 = smov [#allocation2]   ;;  %s629_s19 = scalar_lea.hbm %s790_s1, 512 }
   0x2   :  { %s18_s16 = sshll.u32 %s677_s15, 4  ;;  %p630_p0 = scmp.ne.s32.totalorder %s790_s1, %s629_s19  ;;  %s19_s16 = int_to_ptr.vmem [resolvable:$true] %s18_s16 }
   0x3   :  { %p633_p1 = scmp.lt.u32.totalorder %s629_s19, %s790_s1 }
   0x5   :  { %p635_p2 = pnand %p633_p1, %p630_p0 }
   0x7   :  { %638 = shalt.err (!%p635_p2)
}
   0x8   :  { %s639_s24 = scalar_lea.vmem %s19_s16, 512  ;;  %p644_p4 = scmp.lt.s32.totalorder %s19_s16, %s19_s16 }
   0x9   :  { %p640_p3 = scmp.ne.s32.totalorder %s19_s16, %s639_s24  ;;  %p645_p5 = scmp.lt.s32.totalorder %s639_s24, %s639_s24 }
   0xb   :  { %p646_p6 = por %p645_p5, %p644_p4 }
   0xd   :  { %p647_p7 = pnand %p646_p6, %p640_p3 }
   0xf   :  { %650 = shalt.err (!%p647_p7)
}
  0x10   :  { %s678_s25 = smov 64   ;;  %s679_s26 = smov 4  }
  0x11   :  { %24 = dma.hbm_to_vmem [thread:$0]  %s790_s1, 512, %s19_s16, [#allocation3], %s678_s25, %s678_s25, %s679_s26  }
  0x12   :  { %673 = dma.done.wait [#allocation3], 512  }
  0x13   :  { %674 = vsyncadd [#allocation3], 4294966784  ;;  %v680_v0 = vmov 0   ;;  %v35_v1 = vld [vmem:[%s789_s0 + $0x10] sm:$0xff]  ;;  %v33_v2 = vld [vmem:[%s789_s0] sm:$0xff]  ;;  %v81_v61 = vlaneseq  ;;  %vm167_vm4 = vcmask 523264  }
  0x14   :  { %584 = vset.pattern.permute.xlu1 %v680_v0  ;;  %583 = vset.pattern.permute.xlu0 %v680_v0  ;;  %v36_v3 = vld [vmem:[%s789_s0 + $0x18] sm:$0xff]  ;;  %v43_v4 = vmul.f32 64.0, %v35_v1  ;;  %v41_v5 = vmul.f32 64.0, %v33_v2  ;;  %v34_v7 = vld [vmem:[%s789_s0 + $0x8] sm:$0xff]  ;;  %v37_v9 = vld [vmem:[%s789_s0 + $0x20] sm:$0xff]  ;;  %s682_s8 = smov [#allocation5]  }
  0x15   :  { %v44_v6 = vmul.f32 64.0, %v36_v3  ;;  %v38_v8 = vld [vmem:[%s789_s0 + $0x28] sm:$0xff]  ;;  %v42_v10 = vmul.f32 64.0, %v34_v7  ;;  %v45_v12 = vmul.f32 64.0, %v37_v9  ;;  %v40_v13 = vld [vmem:[%s789_s0 + $0x38] sm:$0xff]  ;;  %v39_v14 = vld [vmem:[%s789_s0 + $0x30] sm:$0xff] }
  0x16   :  { %v46_v11 = vmul.f32 64.0, %v38_v8  ;;  %v585_v15 = vld [vmem:[#allocation2] sm:$0xff]   ;;  %v51_v16 = vfloor.f32 %v43_v4  ;;  %v49_v17 = vfloor.f32 %v41_v5  ;;  %v48_v19 = vmul.f32 64.0, %v40_v13  ;;  %v586_v20 = vld [vmem:[#allocation2 + $0x8] sm:$0xff]   ;;  %v587_v49 = vld [vmem:[#allocation2 + $0x10] sm:$0xff]   ;;  %s454_s1 = sshll.u32 %s682_s8, 4  ;;  %s455_s1 = int_to_ptr.vmem [resolvable:$true] %s454_s1 }
  0x17   :  { %v52_v18 = vfloor.f32 %v44_v6  ;;  %v50_v21 = vfloor.f32 %v42_v10  ;;  %v53_v23 = vfloor.f32 %v45_v12  ;;  %v47_v24 = vmul.f32 64.0, %v39_v14  ;;  %519 = vmatprep.subr.bf16.mxu0 %v585_v15  ;;  %v588_v54 = vld [vmem:[#allocation2 + $0x18] sm:$0xff]   ;;  %p656_p9 = scmp.lt.s32.totalorder %s455_s1, %s455_s1 }
  0x18   :  { %v54_v22 = vfloor.f32 %v46_v11  ;;  %v59_v25 = vmax.f32 %v51_v16, 0.0  ;;  %v57_v26 = vmax.f32 %v49_v17, 0.0  ;;  %v56_v28 = vfloor.f32 %v48_v19  ;;  %520 = vmatpush3.bf16.msra.mxu0 %v585_v15 }
  0x19   :  { %v60_v27 = vmax.f32 %v52_v18, 0.0  ;;  %v58_v29 = vmax.f32 %v50_v21, 0.0  ;;  %v61_v31 = vmax.f32 %v53_v23, 0.0  ;;  %v55_v32 = vfloor.f32 %v47_v24  ;;  %521 = vmatprep.subr.bf16.mxu0 %v586_v20  ;;  %v590_v21 = vld [vmem:[%s791_s2 + $0x8] sm:$0xff]   ;;  %v592_v23 = vld [vmem:[%s791_s2 + $0x18] sm:$0xff]   ;;  %v593_v24 = vld [vmem:[%s791_s2 + $0x20] sm:$0xff]  }
  0x1a   :  { %v62_v30 = vmax.f32 %v54_v22, 0.0  ;;  %v67_v33 = vmin.f32 %v59_v25, 63.0  ;;  %v65_v34 = vmin.f32 %v57_v26, 63.0  ;;  %v64_v36 = vmax.f32 %v56_v28, 0.0  ;;  %v591_v22 = vld [vmem:[%s791_s2 + $0x10] sm:$0xff]   ;;  %v594_v25 = vld [vmem:[%s791_s2 + $0x28] sm:$0xff]  }
  0x1b   :  { %v68_v35 = vmin.f32 %v60_v27, 63.0  ;;  %v66_v37 = vmin.f32 %v58_v29, 63.0  ;;  %v63_v39 = vmax.f32 %v55_v32, 0.0  ;;  %v69_v43 = vmin.f32 %v61_v31, 63.0  ;;  %v595_v26 = vld [vmem:[%s791_s2 + $0x30] sm:$0xff]   ;;  %v596_v27 = vld [vmem:[%s791_s2 + $0x38] sm:$0xff]  }
  0x1c   :  { %v70_v38 = vmin.f32 %v62_v30, 63.0  ;;  %v563_v40 = vtrunc.f32 %v67_v33  ;;  %v559_v41 = vtrunc.f32 %v65_v34  ;;  %522 = vmatpush3.bf16.msra.mxu0 %v586_v20  ;;  %v72_v45 = vmin.f32 %v64_v36, 63.0  ;;  %v589_v20 = vld [vmem:[%s791_s2] sm:$0xff]  }
  0x1d   :  { %v565_v42 = vtrunc.f32 %v68_v35  ;;  %v561_v44 = vtrunc.f32 %v66_v37  ;;  %v71_v48 = vmin.f32 %v63_v39, 63.0  ;;  %v567_v53 = vtrunc.f32 %v69_v43  ;;  %523 = vmatprep.subr.bf16.mxu0 %v587_v49  ;;  %535 = vmatprep.subr.bf16.mxu1 %v589_v20 }
  0x1e   :  { %v564_v46 = vcvt.f32.s32 %v563_v40  ;;  %v560_v47 = vcvt.f32.s32 %v559_v41  ;;  %v569_v52 = vtrunc.f32 %v70_v38  ;;  %v573_v57 = vtrunc.f32 %v72_v45  ;;  %536 = vmatpush3.bf16.msra.mxu1 %v589_v20 }
  0x1f   :  { %v566_v50 = vcvt.f32.s32 %v565_v42  ;;  %v562_v51 = vcvt.f32.s32 %v561_v44  ;;  %v568_v56 = vcvt.f32.s32 %v567_v53  ;;  %v571_v58 = vtrunc.f32 %v71_v48  ;;  %537 = vmatprep.subr.bf16.mxu1 %v590_v21 }
  0x20   :  { %90 = vperm.xlu1 %584, %v564_v46   ;;  %84 = vperm.xlu0 %583, %v560_v47   ;;  %v570_v55 = vcvt.f32.s32 %v569_v52  ;;  %v574_v59 = vcvt.f32.s32 %v573_v57  ;;  %v82_v62 = vand.u32 127, %v81_v61  ;;  %v681_v3 = vmov 0.0  }
  0x21   :  { %524 = vmatpush3.bf16.msra.mxu0 %v587_v49  ;;  %v572_v60 = vcvt.f32.s32 %v571_v58 }
  0x22   :  { %525 = vmatprep.subr.bf16.mxu0 %v588_v54  ;;  %538 = vmatpush3.bf16.msra.mxu1 %v590_v21 }
  0x23   :  { %539 = vmatprep.subr.bf16.mxu1 %v591_v22 }
  0x24   :  { %93 = vperm.xlu1 %584, %v566_v50   ;;  %87 = vperm.xlu0 %583, %v562_v51  }
  0x25   :  { %526 = vmatpush3.bf16.msra.mxu0 %v588_v54 }
  0x26   :  { %540 = vmatpush3.bf16.msra.mxu1 %v591_v22 }
  0x27   :  { %541 = vmatprep.subr.bf16.mxu1 %v592_v23 }
  0x28   :  { %99 = vperm.xlu1 %584, %v570_v55   ;;  %96 = vperm.xlu0 %583, %v568_v56  }
  0x2a   :  { %542 = vmatpush3.bf16.msra.mxu1 %v592_v23 }
  0x2b   :  { %543 = vmatprep.subr.bf16.mxu1 %v593_v24 }
  0x2c   :  { %105 = vperm.xlu1 %584, %v574_v59   ;;  %102 = vperm.xlu0 %583, %v572_v60  }
  0x2e   :  { %544 = vmatpush3.bf16.msra.mxu1 %v593_v24 }
  0x2f   :  { %545 = vmatprep.subr.bf16.mxu1 %v594_v25 }
  0x32   :  { %546 = vmatpush3.bf16.msra.mxu1 %v594_v25 }
  0x33   :  { %547 = vmatprep.subr.bf16.mxu1 %v595_v26 }
  0x36   :  { %548 = vmatpush3.bf16.msra.mxu1 %v595_v26 }
  0x37   :  { %549 = vmatprep.subr.bf16.mxu1 %v596_v27 }
  0x3a   :  { %550 = vmatpush3.bf16.msra.mxu1 %v596_v27 }
  0x9f   :  { %v91_v63 = vpop.permute.xlu1 %90  ;;  %v85_v0 = vpop.permute.xlu0 %84 }
  0xa0   :  { %vm109_vm0 = vcmp.eq.s32.totalorder %v82_v62, %v91_v63  ;;  %vm107_vm1 = vcmp.eq.s32.totalorder %v82_v62, %v85_v0 }
  0xa1   :  { %v468_v4 = vsel %vm109_vm0, 1.0, %v681_v3  ;;  %v466_v5 = vsel %vm107_vm1, 1.0, %v681_v3 }
  0xa3   :  { %v94_v1 = vpop.permute.xlu1 %93  ;;  %v88_v2 = vpop.permute.xlu0 %87 }
  0xa4   :  { %vm110_vm2 = vcmp.eq.s32.totalorder %v82_v62, %v94_v1  ;;  %vm108_vm3 = vcmp.eq.s32.totalorder %v82_v62, %v88_v2 }
  0xa5   :  { %v469_v6 = vsel %vm110_vm2, 1.0, %v681_v3  ;;  %v467_v7 = vsel %vm108_vm3, 1.0, %v681_v3 }
  0xa6   :  { %v132_v8 = vpack.c.bf16 %v469_v6, %v468_v4  ;;  %v131_v9 = vpack.c.bf16 %v467_v7, %v466_v5 }
  0xa7   :  { %v100_v10 = vpop.permute.xlu1 %99  ;;  %v97_v11 = vpop.permute.xlu0 %96 }
  0xa8   :  { %vm112_vm5 = vcmp.eq.s32.totalorder %v82_v62, %v100_v10  ;;  %vm111_vm6 = vcmp.eq.s32.totalorder %v82_v62, %v97_v11  ;;  %527 = vmatprep.mubr.msk.bf16.mxu0 %vm167_vm4, %v131_v9 }
  0xa9   :  { %v471_v12 = vsel %vm112_vm5, 1.0, %v681_v3  ;;  %v470_v13 = vsel %vm111_vm6, 1.0, %v681_v3  ;;  %528 = vmatmul.mubr.msk.bf16.vlgmr.msra.gmra.mrb[0].mxu0 %vm167_vm4, %v132_v8 }
  0xaa   :  { %v133_v14 = vpack.c.bf16 %v471_v12, %v470_v13 }
  0xab   :  { %v106_v15 = vpop.permute.xlu1 %105  ;;  %v103_v16 = vpop.permute.xlu0 %102 }
  0xac   :  { %vm114_vm7 = vcmp.eq.s32.totalorder %v82_v62, %v106_v15  ;;  %vm113_vm8 = vcmp.eq.s32.totalorder %v82_v62, %v103_v16  ;;  %531 = vmatprep.mubr.msk.bf16.mxu0 %vm167_vm4, %v133_v14  ;;  %v490_v16 = vld [vmem:[%s792_s3] ss:$0 sm:$0xff]  ;;  %s651_s3 = scalar_lea.vmem %s455_s1, 1024 }
  0xad   :  { %v473_v17 = vsel %vm114_vm7, 1.0, %v681_v3  ;;  %v472_v18 = vsel %vm113_vm8, 1.0, %v681_v3  ;;  %p652_p8 = scmp.ne.s32.totalorder %s455_s1, %s651_s3  ;;  %p657_p10 = scmp.lt.s32.totalorder %s651_s3, %s651_s3 }
  0xae   :  { %v134_v19 = vpack.c.bf16 %v473_v17, %v472_v18 }
  0xaf   :  { %p658_p11 = por %p657_p10, %p656_p9 }
  0xb1   :  { %532 = vmatmul.mubr.msk.bf16.gmra.mrb[4].mxu0 %vm167_vm4, %v134_v19  ;;  %p659_p12 = pnand %p658_p11, %p652_p8 }
 0x17c   :  { %v529_v28 = vpop.f32.mrb[0].mxu0 }
 0x17d   :  { %v484_v29 = vmul.f32 -1.442695, %v529_v28  ;;  %v214_v30 = vpop.f32.mrb[1].mxu0 }
 0x17e   :  { %v482_v31 = vmul.f32 -1.442695, %v214_v30  ;;  %v530_v32 = vpop.f32.mrb[2].mxu0 }
 0x17f   :  { %597 = vpow2.f32 %v484_v29  ;;  %v485_v33 = vmul.f32 -1.442695, %v530_v32  ;;  %v217_v34 = vpop.f32.mrb[3].mxu0 }
 0x180   :  { %599 = vpow2.f32 %v482_v31  ;;  %v483_v35 = vmul.f32 -1.442695, %v217_v34 }
 0x181   :  { %601 = vpow2.f32 %v485_v33 }
 0x182   :  { %603 = vpow2.f32 %v483_v35 }
 0x184   :  { %v533_v36 = vpop.f32.mrb[4].mxu0 }
 0x185   :  { %v488_v37 = vmul.f32 -1.442695, %v533_v36  ;;  %v230_v38 = vpop.f32.mrb[5].mxu0 }
 0x186   :  { %v486_v39 = vmul.f32 -1.442695, %v230_v38  ;;  %v534_v40 = vpop.f32.mrb[6].mxu0 }
 0x187   :  { %605 = vpow2.f32 %v488_v37  ;;  %v489_v41 = vmul.f32 -1.442695, %v534_v40  ;;  %v233_v42 = vpop.f32.mrb[7].mxu0 }
 0x188   :  { %607 = vpow2.f32 %v486_v39  ;;  %v487_v43 = vmul.f32 -1.442695, %v233_v42 }
 0x189   :  { %v598_v44 = vpop.eup %597  ;;  %609 = vpow2.f32 %v489_v41 }
 0x18a   :  { %v600_v45 = vpop.eup %599  ;;  %v271_v46 = vadd.f32 1.0, %v598_v44  ;;  %611 = vpow2.f32 %v487_v43 }
 0x18b   :  { %v602_v47 = vpop.eup %601  ;;  %v269_v48 = vadd.f32 1.0, %v600_v45 }
 0x18c   :  { %v604_v49 = vpop.eup %603  ;;  %613 = vrcp.f32 %v271_v46  ;;  %v272_v50 = vadd.f32 1.0, %v602_v47 }
 0x18d   :  { %615 = vrcp.f32 %v269_v48  ;;  %v270_v51 = vadd.f32 1.0, %v604_v49 }
 0x18e   :  { %617 = vrcp.f32 %v272_v50 }
 0x18f   :  { %619 = vrcp.f32 %v270_v51 }
 0x191   :  { %v606_v52 = vpop.eup %605 }
 0x192   :  { %v608_v53 = vpop.eup %607  ;;  %v275_v54 = vadd.f32 1.0, %v606_v52 }
 0x193   :  { %v610_v55 = vpop.eup %609  ;;  %v273_v56 = vadd.f32 1.0, %v608_v53 }
 0x194   :  { %v612_v57 = vpop.eup %611  ;;  %621 = vrcp.f32 %v275_v54  ;;  %v276_v58 = vadd.f32 1.0, %v610_v55 }
 0x195   :  { %623 = vrcp.f32 %v273_v56  ;;  %v274_v59 = vadd.f32 1.0, %v612_v57 }
 0x196   :  { %v614_v60 = vpop.eup %613  ;;  %625 = vrcp.f32 %v276_v58 }
 0x197   :  { %v616_v61 = vpop.eup %615  ;;  %627 = vrcp.f32 %v274_v59  ;;  %v295_v0 = vmul.f32 %v614_v60, %v529_v28 }
 0x198   :  { %v618_v62 = vpop.eup %617  ;;  %v293_v2 = vmul.f32 %v616_v61, %v214_v30 }
 0x199   :  { %v620_v63 = vpop.eup %619  ;;  %v296_v1 = vmul.f32 %v618_v62, %v530_v32 }
 0x19a   :  { %v294_v3 = vmul.f32 %v620_v63, %v217_v34 }
 0x19b   :  { %v302_v4 = vpack.c.bf16 %v296_v1, %v295_v0 }
 0x19c   :  { %v301_v5 = vpack.c.bf16 %v294_v3, %v293_v2 }
 0x19e   :  { %v622_v6 = vpop.eup %621  ;;  %551 = vmatprep.mubr.bf16.mxu1 %v301_v5 }
 0x19f   :  { %v624_v7 = vpop.eup %623  ;;  %552 = vmatmul.mubr.bf16.vlgmr.msra.gmra.mrb[0].mxu1 %v302_v4  ;;  %v299_v10 = vmul.f32 %v622_v6, %v533_v36 }
 0x1a0   :  { %v626_v8 = vpop.eup %625  ;;  %v297_v12 = vmul.f32 %v624_v7, %v230_v38 }
 0x1a1   :  { %v628_v9 = vpop.eup %627  ;;  %v300_v11 = vmul.f32 %v626_v8, %v534_v40 }
 0x1a2   :  { %v298_v13 = vmul.f32 %v628_v9, %v233_v42 }
 0x1a3   :  { %v304_v14 = vpack.c.bf16 %v300_v11, %v299_v10 }
 0x1a4   :  { %v303_v15 = vpack.c.bf16 %v298_v13, %v297_v12 }
 0x1a6   :  { %555 = vmatprep.mubr.bf16.mxu1 %v303_v15 }
 0x1a7   :  { %556 = vmatmul.mubr.bf16.gmra.mrb[4].mxu1 %v304_v14 }
 0x272   :  { %v553_v17 = vpop.f32.mrb[0].mxu1 }
 0x273   :  { %v419_v18 = vadd.f32 %v553_v17, %v490_v16  ;;  %v410_v19 = vpop.f32.mrb[1].mxu1 }
 0x274   :  { %v411_v20 = vadd.f32 %v490_v16, %v410_v19  ;;  %v554_v21 = vpop.f32.mrb[2].mxu1 }
 0x275   :  { %443 = vst [vmem:[#allocation5 + $0x10] sm:$0xff] %v419_v18  ;;  %v422_v22 = vadd.f32 %v554_v21, %v490_v16  ;;  %v413_v23 = vpop.f32.mrb[3].mxu1 }
 0x276   :  { %441 = vst [vmem:[#allocation5] sm:$0xff] %v411_v20  ;;  %v414_v24 = vadd.f32 %v490_v16, %v413_v23 }
 0x277   :  { %444 = vst [vmem:[#allocation5 + $0x18] sm:$0xff] %v422_v22 }
 0x278   :  { %442 = vst [vmem:[#allocation5 + $0x8] sm:$0xff] %v414_v24 }
 0x27a   :  { %v557_v25 = vpop.f32.mrb[4].mxu1 }
 0x27b   :  { %v435_v26 = vadd.f32 %v557_v25, %v490_v16  ;;  %v426_v27 = vpop.f32.mrb[5].mxu1 }
 0x27c   :  { %v427_v28 = vadd.f32 %v490_v16, %v426_v27  ;;  %v558_v29 = vpop.f32.mrb[6].mxu1 }
 0x27d   :  { %447 = vst [vmem:[#allocation5 + $0x30] sm:$0xff] %v435_v26  ;;  %v438_v30 = vadd.f32 %v558_v29, %v490_v16  ;;  %v429_v31 = vpop.f32.mrb[7].mxu1 }
 0x27e   :  { %445 = vst [vmem:[#allocation5 + $0x20] sm:$0xff] %v427_v28  ;;  %v430_v32 = vadd.f32 %v490_v16, %v429_v31 }
 0x27f   :  { %448 = vst [vmem:[#allocation5 + $0x38] sm:$0xff] %v438_v30 }
 0x280   :  { %446 = vst [vmem:[#allocation5 + $0x28] sm:$0xff] %v430_v32 }
 0x281   :  { %662 = shalt.err (!%p659_p12)
}
 0x282   :  { %s663_s11 = scalar_lea.hbm %s793_s4, 1024 }
 0x283   :  { %p664_p13 = scmp.ne.s32.totalorder %s793_s4, %s663_s11  ;;  %p667_p0 = scmp.lt.u32.totalorder %s663_s11, %s793_s4 }
 0x285   :  { %p669_p1 = pnand %p667_p0, %p664_p13 }
 0x287   :  { %672 = shalt.err (!%p669_p1)
}
 0x288   :  { %s683_s16 = smov 128   ;;  %s684_s17 = smov 8  }
 0x289   :  { %460 = dma.vmem_to_hbm [thread:$0]  %s455_s1, 1024, %s793_s4, [#allocation4], %s683_s16, %s683_s16, %s684_s17  }
 0x28a   :  { %675 = dma.done.wait [#allocation4], 1024  }
 0x28b   :  { %676 = vsyncadd [#allocation4], 4294966272 }
 0x28c   :  { %464 = vsyncpa [#allocation3], 1 }
 0x28d   :  { %465 = vsyncpa [#allocation4], 1 }

</bundles_post_ra>
